<compile_context>
chip_gen: v7x
topology: tpu7x:2x2x1
jax: 0.10.0
libtpu: 0.0.40
codegen_flags: <defaults>
</compile_context>

<pallas_src>
import functools

import jax
import jax.numpy as jnp
from jax.experimental import pallas as pl
from jax.experimental.pallas import tpu as pltpu

NEG_SLOPE = 0.1  # LeakyReLU negative_slope


def _same_pads(k):
    total = k - 1
    lo = total // 2
    return lo, total - lo


def _round_up(x, m):
    return (x + m - 1) // m * m


# ---------------------------------------------------------------------------
# Pallas kernel: in-VMEM im2col (lane-shifted taps) + matmul + bias + LeakyReLU
# ---------------------------------------------------------------------------
def _conv_lrelu_kernel(x_ref, w_ref, o_ref, *, kh_kw, wp, lout):
    # x_ref: (C_in+1, Lin)        padded image, padded spatial flattened on lanes
    #                             (lane p = hp*Wp + wp); last channel is all-ones.
    # w_ref: (KH*KW, C4, C_in+1)  per-tap weights; bias lives in tap 0's last col.
    # o_ref: (C4, Lout)           conv + bias + LeakyReLU; valid lane L = h*Wp + w.
    c4 = o_ref.shape[0]
    acc = jnp.zeros((c4, lout), jnp.float32)
    for t, (kh, kw) in enumerate(kh_kw):
        d = kh * wp + kw                          # static lane offset of this tap
        xs = x_ref[:, pl.ds(d, lout)]             # shifted in-VMEM view (C_in+1, Lout)
        acc += jnp.dot(w_ref[t], xs, preferred_element_type=jnp.float32)
    acc = jnp.where(acc >= 0, acc, NEG_SLOPE * acc)   # LeakyReLU(0.1), f32 VPU
    o_ref[...] = acc.astype(o_ref.dtype)


# ---------------------------------------------------------------------------
# Upscale forward (NCHW in / NCHW out), pallas_call wrapper (jitted)
# ---------------------------------------------------------------------------
def _upscale_forward_impl(x, weight, bias, *, compute_dtype=jnp.float32):
    """x: (N, C_in, H, W); weight: (C4, C_in, KH, KW); bias: (C4,)."""
    N, C_in, H, W = x.shape
    C4, _, KH, KW = weight.shape
    oc = C4 // 4
    ph, pw = _same_pads(KH), _same_pads(KW)
    Hp, Wp = H + KH - 1, W + KW - 1
    T = KH * KW
    max_shift = (KH - 1) * Wp + (KW - 1)
    Lout = _round_up(H * Wp, 128)             # lane-dense output lanes per image
    Lin = _round_up(Lout + max_shift, 128)    # headroom so every tap slice is in-bounds

    # --- input prep: pad + flatten + ones(bias) channel (fuses under jit) ---
    xp = jnp.pad(x, ((0, 0), (0, 0), ph, pw))                    # (N, C_in, Hp, Wp)
    xf = xp.reshape(N, C_in, Hp * Wp)
    xf = jnp.pad(xf, ((0, 0), (0, 0), (0, Lin - Hp * Wp)))
    ones = jnp.ones((N, 1, Lin), xf.dtype)                       # bias carrier channel
    xf = jnp.concatenate([xf, ones], axis=1).astype(compute_dtype)  # (N, C_in+1, Lin)

    # --- weights: (tap, C4, C_in) with bias folded as tap-0 extra column ---
    w_perm = jnp.transpose(weight, (2, 3, 0, 1)).reshape(T, C4, C_in)
    bcol = jnp.zeros((T, C4, 1), weight.dtype).at[0, :, 0].set(bias)
    w_taps = jnp.concatenate([w_perm, bcol], axis=-1).astype(compute_dtype)

    kh_kw = tuple((t // KW, t % KW) for t in range(T))
    kernel = functools.partial(_conv_lrelu_kernel, kh_kw=kh_kw, wp=Wp, lout=Lout)

    itemsize = jnp.dtype(compute_dtype).itemsize
    bytes_accessed = (xf.size + w_taps.size) * itemsize \
        + N * C4 * Lout * jnp.dtype(x.dtype).itemsize
    cost = pl.CostEstimate(flops=2 * N * T * C4 * (C_in + 1) * Lout,
                           transcendentals=0,
                           bytes_accessed=int(bytes_accessed))

    y_flat = pl.pallas_call(
        kernel,
        out_shape=jax.ShapeDtypeStruct((N, C4, Lout), x.dtype),
        grid=(N,),
        in_specs=[
            pl.BlockSpec((pl.Squeezed(), C_in + 1, Lin), lambda n: (n, 0, 0)),
            pl.BlockSpec((T, C4, C_in + 1), lambda n: (0, 0, 0)),  # constant: resident
        ],
        out_specs=pl.BlockSpec((pl.Squeezed(), C4, Lout), lambda n: (n, 0, 0)),
        compiler_params=pltpu.CompilerParams(dimension_semantics=("parallel",)),
        cost_estimate=cost,
    )(xf, w_taps)

    # --- valid-lane extraction + depth_to_space as ONE reshape/transpose ---
    # kernel lane L = h*Wp + w  ->  (N, C4, H, W)
    y = y_flat[:, :, :H * Wp].reshape(N, C4, H, Wp)[:, :, :, :W]
    # reference depth_to_space == memory reorder (s1,s2,oc,h,w) -> (h,s1,w,s2,oc)
    y = y.reshape(N, 2, 2, oc, H, W)                 # (n, s1, s2, oc, h, w)
    y = jnp.transpose(y, (0, 4, 1, 5, 2, 3))         # (n, h, s1, w, s2, oc)
    return y.reshape(N, oc, 2 * H, 2 * W)            # same reinterp as the reference


upscale_forward = jax.jit(_upscale_forward_impl, static_argnames=("compute_dtype",))


# ---------------------------------------------------------------------------
# Pure-JAX reference for verification (mirrors the PyTorch module exactly)
# ---------------------------------------------------------------------------
def depth_to_space_reference(x, size):
    b, c, h, w = x.shape
    oc = c // (size * size)
    x = jnp.transpose(x, (0, 2, 3, 1))
    x = x.reshape(b, h, w, size, size, oc)
    x = jnp.transpose(x, (0, 1, 3, 2, 4, 5))
    return x.reshape(b, oc, h * size, w * size)


def upscale_reference(x, weight, bias):
    KH, KW = weight.shape[2], weight.shape[3]
    y = jax.lax.conv_general_dilated(
        x, weight, window_strides=(1, 1),
        padding=(_same_pads(KH), _same_pads(KW)),
        dimension_numbers=("NCHW", "OIHW", "NCHW"))
    y = y + bias[None, :, None, None]
    y = jnp.where(y >= 0, y, NEG_SLOPE * y)
    return depth_to_space_reference(y, 2)


def init_upscale_params(key, in_ch, out_ch, kernel_size):
    c4 = out_ch * 4
    fan_in = in_ch * kernel_size * kernel_size
    bound = 1.0 / jnp.sqrt(fan_in)
    kw_key, kb_key = jax.random.split(key)
    w = jax.random.uniform(kw_key, (c4, in_ch, kernel_size, kernel_size),
                           minval=-bound, maxval=bound, dtype=jnp.float32)
    b = jax.random.uniform(kb_key, (c4,), minval=-bound, maxval=bound,
                           dtype=jnp.float32)
    return w, b


if __name__ == "__main__":
    # Upscale(in_ch=4, out_ch=8, kernel_size=3) on a (2, 4, 16, 16) input.
    in_ch, out_ch, kernel_size = 4, 8, 3
    key = jax.random.PRNGKey(0)
    key, xk, pk = jax.random.split(key, 3)

    x = jax.random.normal(xk, (2, in_ch, 16, 16), dtype=jnp.float32)  # NCHW
    w, b = init_upscale_params(pk, in_ch, out_ch, kernel_size)

    out = jax.block_until_ready(upscale_forward(x, w, b))
    ref = jax.block_until_ready(upscale_reference(x, w, b))

    assert out.shape == (2, out_ch, 32, 32), out.shape
    assert jnp.allclose(out, ref, atol=1e-4, rtol=1e-4), \
        float(jnp.max(jnp.abs(out - ref)))

    print("KERNEL_OK")
</pallas_src>

<mosaic_0001>
module attributes {stable_mosaic.version = 11 : i64} {
  func.func @_conv_lrelu_kernel(%arg0: i32, %arg1: memref<1x5x512xf32, #tpu.memory_space<vmem>>, %arg2: memref<9x32x5xf32, #tpu.memory_space<vmem>>, %arg3: memref<1x32x384xf32, #tpu.memory_space<vmem>>) attributes {dimension_semantics = [#tpu.dimension_semantics<parallel>], iteration_bounds = array<i64: 2>, scalar_prefetch = 0 : i64, scratch_operands = 0 : i64, tpu.core_type = #tpu.core_type<tc>, window_params = [{transform_indices = @transform_0, window_bounds = array<i64: 1, 5, 512>}, {pipeline_mode = #tpu.pipeline_mode<synchronous>, transform_indices = @transform_1, window_bounds = array<i64: 9, 32, 5>}, {transform_indices = @transform_2, window_bounds = array<i64: 1, 32, 384>}]} {
    %cst = arith.constant 0.000000e+00 : f32
    %0 = vector.broadcast %cst : f32 to vector<32x384xf32>
    %c0 = arith.constant 0 : index
    %c0_0 = arith.constant 0 : index
    %c0_1 = arith.constant 0 : index
    %1 = vector.load %arg1[%c0, %c0_0, %c0_1] : memref<1x5x512xf32, #tpu.memory_space<vmem>>, vector<1x5x384xf32>
    %2 = vector.shape_cast %1 : vector<1x5x384xf32> to vector<5x384xf32>
    %c0_2 = arith.constant 0 : index
    %c0_3 = arith.constant 0 : index
    %c0_4 = arith.constant 0 : index
    %3 = vector.load %arg2[%c0_2, %c0_3, %c0_4] : memref<9x32x5xf32, #tpu.memory_space<vmem>>, vector<1x32x5xf32>
    %4 = vector.shape_cast %3 : vector<1x32x5xf32> to vector<32x5xf32>
    %cst_5 = arith.constant dense<0.000000e+00> : vector<32x384xf32>
    %5 = tpu.matmul %4, %2, %cst_5 {dimension_numbers = #tpu.dot_dimension_numbers<[1], [0], [0], [1], [0, 0, 1, 1], [], []>} : vector<32x5xf32>, vector<5x384xf32>, vector<32x384xf32> -> vector<32x384xf32>
    %6 = arith.addf %0, %5 : vector<32x384xf32>
    %c0_6 = arith.constant 0 : index
    %c0_7 = arith.constant 0 : index
    %c1 = arith.constant 1 : index
    %7 = vector.load %arg1[%c0_6, %c0_7, %c1] : memref<1x5x512xf32, #tpu.memory_space<vmem>>, vector<1x5x384xf32>
    %8 = vector.shape_cast %7 : vector<1x5x384xf32> to vector<5x384xf32>
    %c1_8 = arith.constant 1 : index
    %c0_9 = arith.constant 0 : index
    %c0_10 = arith.constant 0 : index
    %9 = vector.load %arg2[%c1_8, %c0_9, %c0_10] : memref<9x32x5xf32, #tpu.memory_space<vmem>>, vector<1x32x5xf32>
    %10 = vector.shape_cast %9 : vector<1x32x5xf32> to vector<32x5xf32>
    %cst_11 = arith.constant dense<0.000000e+00> : vector<32x384xf32>
    %11 = tpu.matmul %10, %8, %cst_11 {dimension_numbers = #tpu.dot_dimension_numbers<[1], [0], [0], [1], [0, 0, 1, 1], [], []>} : vector<32x5xf32>, vector<5x384xf32>, vector<32x384xf32> -> vector<32x384xf32>
    %12 = arith.addf %6, %11 : vector<32x384xf32>
    %c0_12 = arith.constant 0 : index
    %c0_13 = arith.constant 0 : index
    %c2 = arith.constant 2 : index
    %13 = vector.load %arg1[%c0_12, %c0_13, %c2] : memref<1x5x512xf32, #tpu.memory_space<vmem>>, vector<1x5x384xf32>
    %14 = vector.shape_cast %13 : vector<1x5x384xf32> to vector<5x384xf32>
    %c2_14 = arith.constant 2 : index
    %c0_15 = arith.constant 0 : index
    %c0_16 = arith.constant 0 : index
    %15 = vector.load %arg2[%c2_14, %c0_15, %c0_16] : memref<9x32x5xf32, #tpu.memory_space<vmem>>, vector<1x32x5xf32>
    %16 = vector.shape_cast %15 : vector<1x32x5xf32> to vector<32x5xf32>
    %cst_17 = arith.constant dense<0.000000e+00> : vector<32x384xf32>
    %17 = tpu.matmul %16, %14, %cst_17 {dimension_numbers = #tpu.dot_dimension_numbers<[1], [0], [0], [1], [0, 0, 1, 1], [], []>} : vector<32x5xf32>, vector<5x384xf32>, vector<32x384xf32> -> vector<32x384xf32>
    %18 = arith.addf %12, %17 : vector<32x384xf32>
    %c0_18 = arith.constant 0 : index
    %c0_19 = arith.constant 0 : index
    %c18 = arith.constant 18 : index
    %19 = vector.load %arg1[%c0_18, %c0_19, %c18] : memref<1x5x512xf32, #tpu.memory_space<vmem>>, vector<1x5x384xf32>
    %20 = vector.shape_cast %19 : vector<1x5x384xf32> to vector<5x384xf32>
    %c3 = arith.constant 3 : index
    %c0_20 = arith.constant 0 : index
    %c0_21 = arith.constant 0 : index
    %21 = vector.load %arg2[%c3, %c0_20, %c0_21] : memref<9x32x5xf32, #tpu.memory_space<vmem>>, vector<1x32x5xf32>
    %22 = vector.shape_cast %21 : vector<1x32x5xf32> to vector<32x5xf32>
    %cst_22 = arith.constant dense<0.000000e+00> : vector<32x384xf32>
    %23 = tpu.matmul %22, %20, %cst_22 {dimension_numbers = #tpu.dot_dimension_numbers<[1], [0], [0], [1], [0, 0, 1, 1], [], []>} : vector<32x5xf32>, vector<5x384xf32>, vector<32x384xf32> -> vector<32x384xf32>
    %24 = arith.addf %18, %23 : vector<32x384xf32>
    %c0_23 = arith.constant 0 : index
    %c0_24 = arith.constant 0 : index
    %c19 = arith.constant 19 : index
    %25 = vector.load %arg1[%c0_23, %c0_24, %c19] : memref<1x5x512xf32, #tpu.memory_space<vmem>>, vector<1x5x384xf32>
    %26 = vector.shape_cast %25 : vector<1x5x384xf32> to vector<5x384xf32>
    %c4 = arith.constant 4 : index
    %c0_25 = arith.constant 0 : index
    %c0_26 = arith.constant 0 : index
    %27 = vector.load %arg2[%c4, %c0_25, %c0_26] : memref<9x32x5xf32, #tpu.memory_space<vmem>>, vector<1x32x5xf32>
    %28 = vector.shape_cast %27 : vector<1x32x5xf32> to vector<32x5xf32>
    %cst_27 = arith.constant dense<0.000000e+00> : vector<32x384xf32>
    %29 = tpu.matmul %28, %26, %cst_27 {dimension_numbers = #tpu.dot_dimension_numbers<[1], [0], [0], [1], [0, 0, 1, 1], [], []>} : vector<32x5xf32>, vector<5x384xf32>, vector<32x384xf32> -> vector<32x384xf32>
    %30 = arith.addf %24, %29 : vector<32x384xf32>
    %c0_28 = arith.constant 0 : index
    %c0_29 = arith.constant 0 : index
    %c20 = arith.constant 20 : index
    %31 = vector.load %arg1[%c0_28, %c0_29, %c20] : memref<1x5x512xf32, #tpu.memory_space<vmem>>, vector<1x5x384xf32>
    %32 = vector.shape_cast %31 : vector<1x5x384xf32> to vector<5x384xf32>
    %c5 = arith.constant 5 : index
    %c0_30 = arith.constant 0 : index
    %c0_31 = arith.constant 0 : index
    %33 = vector.load %arg2[%c5, %c0_30, %c0_31] : memref<9x32x5xf32, #tpu.memory_space<vmem>>, vector<1x32x5xf32>
    %34 = vector.shape_cast %33 : vector<1x32x5xf32> to vector<32x5xf32>
    %cst_32 = arith.constant dense<0.000000e+00> : vector<32x384xf32>
    %35 = tpu.matmul %34, %32, %cst_32 {dimension_numbers = #tpu.dot_dimension_numbers<[1], [0], [0], [1], [0, 0, 1, 1], [], []>} : vector<32x5xf32>, vector<5x384xf32>, vector<32x384xf32> -> vector<32x384xf32>
    %36 = arith.addf %30, %35 : vector<32x384xf32>
    %c0_33 = arith.constant 0 : index
    %c0_34 = arith.constant 0 : index
    %c36 = arith.constant 36 : index
    %37 = vector.load %arg1[%c0_33, %c0_34, %c36] : memref<1x5x512xf32, #tpu.memory_space<vmem>>, vector<1x5x384xf32>
    %38 = vector.shape_cast %37 : vector<1x5x384xf32> to vector<5x384xf32>
    %c6 = arith.constant 6 : index
    %c0_35 = arith.constant 0 : index
    %c0_36 = arith.constant 0 : index
    %39 = vector.load %arg2[%c6, %c0_35, %c0_36] : memref<9x32x5xf32, #tpu.memory_space<vmem>>, vector<1x32x5xf32>
    %40 = vector.shape_cast %39 : vector<1x32x5xf32> to vector<32x5xf32>
    %cst_37 = arith.constant dense<0.000000e+00> : vector<32x384xf32>
    %41 = tpu.matmul %40, %38, %cst_37 {dimension_numbers = #tpu.dot_dimension_numbers<[1], [0], [0], [1], [0, 0, 1, 1], [], []>} : vector<32x5xf32>, vector<5x384xf32>, vector<32x384xf32> -> vector<32x384xf32>
    %42 = arith.addf %36, %41 : vector<32x384xf32>
    %c0_38 = arith.constant 0 : index
    %c0_39 = arith.constant 0 : index
    %c37 = arith.constant 37 : index
    %43 = vector.load %arg1[%c0_38, %c0_39, %c37] : memref<1x5x512xf32, #tpu.memory_space<vmem>>, vector<1x5x384xf32>
    %44 = vector.shape_cast %43 : vector<1x5x384xf32> to vector<5x384xf32>
    %c7 = arith.constant 7 : index
    %c0_40 = arith.constant 0 : index
    %c0_41 = arith.constant 0 : index
    %45 = vector.load %arg2[%c7, %c0_40, %c0_41] : memref<9x32x5xf32, #tpu.memory_space<vmem>>, vector<1x32x5xf32>
    %46 = vector.shape_cast %45 : vector<1x32x5xf32> to vector<32x5xf32>
    %cst_42 = arith.constant dense<0.000000e+00> : vector<32x384xf32>
    %47 = tpu.matmul %46, %44, %cst_42 {dimension_numbers = #tpu.dot_dimension_numbers<[1], [0], [0], [1], [0, 0, 1, 1], [], []>} : vector<32x5xf32>, vector<5x384xf32>, vector<32x384xf32> -> vector<32x384xf32>
    %48 = arith.addf %42, %47 : vector<32x384xf32>
    %c0_43 = arith.constant 0 : index
    %c0_44 = arith.constant 0 : index
    %c38 = arith.constant 38 : index
    %49 = vector.load %arg1[%c0_43, %c0_44, %c38] : memref<1x5x512xf32, #tpu.memory_space<vmem>>, vector<1x5x384xf32>
    %50 = vector.shape_cast %49 : vector<1x5x384xf32> to vector<5x384xf32>
    %c8 = arith.constant 8 : index
    %c0_45 = arith.constant 0 : index
    %c0_46 = arith.constant 0 : index
    %51 = vector.load %arg2[%c8, %c0_45, %c0_46] : memref<9x32x5xf32, #tpu.memory_space<vmem>>, vector<1x32x5xf32>
    %52 = vector.shape_cast %51 : vector<1x32x5xf32> to vector<32x5xf32>
    %cst_47 = arith.constant dense<0.000000e+00> : vector<32x384xf32>
    %53 = tpu.matmul %52, %50, %cst_47 {dimension_numbers = #tpu.dot_dimension_numbers<[1], [0], [0], [1], [0, 0, 1, 1], [], []>} : vector<32x5xf32>, vector<5x384xf32>, vector<32x384xf32> -> vector<32x384xf32>
    %54 = arith.addf %48, %53 : vector<32x384xf32>
    %cst_48 = arith.constant 0.000000e+00 : f32
    %55 = vector.broadcast %cst_48 : f32 to vector<32x384xf32>
    %56 = arith.cmpf oge, %54, %55 : vector<32x384xf32>
    %cst_49 = arith.constant 1.000000e-01 : f32
    %57 = vector.broadcast %cst_49 : f32 to vector<32x384xf32>
    %58 = arith.mulf %57, %54 : vector<32x384xf32>
    %59 = arith.select %56, %54, %58 : vector<32x384xi1>, vector<32x384xf32>
    %c0_50 = arith.constant 0 : index
    %c0_51 = arith.constant 0 : index
    %c0_52 = arith.constant 0 : index
    %60 = vector.load %arg3[%c0_50, %c0_51, %c0_52] : memref<1x32x384xf32, #tpu.memory_space<vmem>>, vector<1x32x384xf32>
    %61 = vector.shape_cast %60 : vector<1x32x384xf32> to vector<32x384xf32>
    %62 = vector.shape_cast %59 : vector<32x384xf32> to vector<1x32x384xf32>
    tpu.vector_store %arg3[%c0_50, %c0_51, %c0_52], %62 {strides = array<i32>} : memref<1x32x384xf32, #tpu.memory_space<vmem>>, vector<1x32x384xf32>,
    return
  }
  func.func @transform_0(%arg0: i32) -> (i32, i32, i32) {
    %c0_i32 = arith.constant 0 : i32
    %c0_i32_0 = arith.constant 0 : i32
    %c0_i32_1 = arith.constant 0 : i32
    return %arg0, %c0_i32, %c0_i32_0 : i32, i32, i32
  }
  func.func @transform_1(%arg0: i32) -> (i32, i32, i32) {
    %c0_i32 = arith.constant 0 : i32
    %c0_i32_0 = arith.constant 0 : i32
    %c0_i32_1 = arith.constant 0 : i32
    %c0_i32_2 = arith.constant 0 : i32
    return %c0_i32, %c0_i32_0, %c0_i32_1 : i32, i32, i32
  }
  func.func @transform_2(%arg0: i32) -> (i32, i32, i32) {
    %c0_i32 = arith.constant 0 : i32
    %c0_i32_0 = arith.constant 0 : i32
    %c0_i32_1 = arith.constant 0 : i32
    return %arg0, %c0_i32, %c0_i32_0 : i32, i32, i32
  }
}

</mosaic_0001>

<bundles_post_ra>
// kernel: _upscale_forward_impl.1
= control target key start
LH: loop header
LB: loop body
LE: loop exit
PB: predicated region body
PF: predicated region fallthrough
CT: control target
= control target key end

     0   :  { %s2616_s9 = smov 0   ;;  %s3055_s0 = inlined_call_operand.vmem [shape: f32[2,5,512], index: 0, kind: input, shape index: {}]   ;;  %s3056_s1 = inlined_call_operand.vmem [shape: f32[9,32,5], index: 1, kind: input, shape index: {}]   ;;  %s3057_s2 = inlined_call_operand.vmem [shape: f32[2,32,384], index: 2, kind: output, shape index: {}]  }
   0x1 LB: > { %s2209_s10 = sadd.s32 4294967295, %s2590_s9   ;;  %p2213_p0 = scmp.ge.s32.totalorder %s2590_s9, 1  ;;  %s2590_s9 = sphi %s2616_s9, %s12_s9  }
   0x2   : > { %p112_p1 = scmp.lt.s32.totalorder %s2590_s9, 3 }
   0x4   : > { %p113_p2 = pnand %p2213_p0, %p112_p1 }
   0x5   : > { %p134_p3 = scmp.lt.s32.totalorder (!%p113_p2), %s2209_s10, 1  ;;  %v2592_v0 = vmov (!%p113_p2), 0.0   ;;  %s2593_s15 = smov (!%p113_p2), 126   ;;  %vm186_vm0 = vcmask (!%p113_p2), 1044480   ;;  %vm572_vm1 = vcmask (!%p113_p2), 1031168   ;;  %vm173_vm2 = vcmask (!%p113_p2), 39936  }
   0x6   : > { %116 = sbr.rel (%p113_p2) target bundleno = 464 (0x1d0), region = 28  ;;  %658 = vmatprep.mubr.f32.mxu0 (!%p113_p2), %v2592_v0  ;;  %257 = vmatprep.mubr.f32.mxu1 (!%p113_p2), %v2592_v0  ;;  %s2594_s16 = smov (!%p113_p2), 127   ;;  %v2671_v10 = vld [vmem:[%s3056_s1 + $0x40] sm:$0xff] (!%p113_p2)  ;;  %vm169_vm3 = vcmask (!%p113_p2), 1039360   ;;  %v2691_v17 = vld [vmem:[%s3056_s1 + $0x48] sm:$0xff] (!%p113_p2)  ;;  %vm793_vm4 = vcmask (!%p113_p2), 900096  }
   0x7   : > { %s2595_s17 = smov (!%p113_p2), 110   ;;  %s2596_s18 = smov (!%p113_p2), 109   ;;  %v2217_v16 = vld [vmem:[%s3056_s1 + $0x20] sm:$0xff] (!%p113_p2)  ;;  %v2218_v21 = vld [vmem:[%s3056_s1 + $0x28] sm:$0xff] (!%p113_p2)  ;;  %v2710_v22 = vld [vmem:[%s3056_s1 + $0x50] sm:$0xff] (!%p113_p2)  ;;  %vm1014_vm5 = vcmask (!%p113_p2), 891904  }
   0x8   : > { %s2597_s19 = smov (!%p113_p2), 108   ;;  %s2598_s20 = smov (!%p113_p2), 92   ;;  %v2219_v27 = vld [vmem:[%s3056_s1 + $0x30] sm:$0xff] (!%p113_p2)  ;;  %v2726_v28 = vld [vmem:[%s3056_s1 + $0x60] sm:$0xff] (!%p113_p2)  ;;  %v2220_v32 = vld [vmem:[%s3056_s1 + $0x38] sm:$0xff] (!%p113_p2)  ;;  %vm1235_vm6 = vcmask (!%p113_p2), 883712  }
   0x9   : > { %s2599_s21 = smov (!%p113_p2), 91   ;;  %s2600_s22 = smov (!%p113_p2), 90   ;;  %v2746_v33 = vld [vmem:[%s3056_s1 + $0x68] sm:$0xff] (!%p113_p2)  ;;  %v2760_v36 = vld [vmem:[%s3056_s1 + $0x70] sm:$0xff] (!%p113_p2)  ;;  %v2775_v40 = vld [vmem:[%s3056_s1 + $0x78] sm:$0xff] (!%p113_p2)  ;;  %vm1456_vm7 = vcmask (!%p113_p2), 752640  }
   0xa   : > { %v147_v43 = vld [vmem:[%s3056_s1] sm:$0xff] (!%p113_p2)  ;;  %v148_v46 = vld [vmem:[%s3056_s1 + $0x8] sm:$0xff] (!%p113_p2)  ;;  %v149_v51 = vld [vmem:[%s3056_s1 + $0x10] sm:$0xff] (!%p113_p2)  ;;  %vm1677_vm8 = vcmask (!%p113_p2), 744448   ;;  %vm1898_vm9 = vcmask (!%p113_p2), 736256  }
   0xb   : > { %v2793_v44 = vld [vmem:[%s3056_s1 + $0x80] sm:$0xff] (!%p113_p2)  ;;  %v2808_v47 = vld [vmem:[%s3056_s1 + $0x88] sm:$0xff] (!%p113_p2)  ;;  %v2829_v52 = vld [vmem:[%s3056_s1 + $0x90] sm:$0xff] (!%p113_p2) }
   0xc   : > { %v150_v54 = vld [vmem:[%s3056_s1 + $0x18] sm:$0xff] (!%p113_p2)  ;;  %v2853_v57 = vld [vmem:[%s3056_s1 + $0xa0] sm:$0xff] (!%p113_p2)  ;;  %v2867_v62 = vld [vmem:[%s3056_s1 + $0xa8] sm:$0xff] (!%p113_p2) }
   0xd   : > { %s3059_s10 = smov (!%p134_p3, %s2209_s10), 1  ;;  %v2843_v55 = vld [vmem:[%s3056_s1 + $0x98] sm:$0xff] }
   0xe   : > { %s2350_s11 = sshll.u32 %s3059_s10, 5 }
   0xf   : > { %s138_s14 = scalar_lea.vmem %s3055_s0, %s2350_s11 }
  0x10   : > { %v2632_v1 = vld [vmem:[%s138_s14 + $0x8] sm:$0x1f]  ;;  %v2634_v2 = vld [vmem:[%s138_s14] sm:$0x1f]  ;;  %v2638_v3 = vld [vmem:[%s138_s14 + $0x10] sm:$0x1f] }
  0x11   : > { %566 = vrot.lane.b32.xlu0 %v2632_v1, %s2593_s15  ;;  %564 = vrot.lane.b32.xlu1 %v2634_v2, %s2593_s15  ;;  %v151_v4 = vld [vmem:[%s138_s14 + $0x18] sm:$0x1f] }
  0x15   : > { %568 = vrot.lane.b32.xlu0 %v2638_v3, %s2593_s15  ;;  %163 = vrot.lane.b32.xlu1 %v2632_v1, %s2594_s16 }
  0x19   : > { %165 = vrot.lane.b32.xlu0 %v2638_v3, %s2594_s16  ;;  %161 = vrot.lane.b32.xlu1 %v2634_v2, %s2594_s16 }
  0x1d   : > { %787 = vrot.lane.b32.xlu0 %v2632_v1, %s2595_s17  ;;  %789 = vrot.lane.b32.xlu1 %v2638_v3, %s2595_s17 }
  0x21   : > { %785 = vrot.lane.b32.xlu0 %v2634_v2, %s2595_s17  ;;  %167 = vrot.lane.b32.xlu1 %v151_v4, %s2594_s16 }
  0x25   : > { %1008 = vrot.lane.b32.xlu0 %v2632_v1, %s2596_s18  ;;  %1010 = vrot.lane.b32.xlu1 %v2638_v3, %s2596_s18 }
  0x29   : > { %1006 = vrot.lane.b32.xlu0 %v2634_v2, %s2596_s18  ;;  %1229 = vrot.lane.b32.xlu1 %v2632_v1, %s2597_s19 }
  0x2d   : > { %1231 = vrot.lane.b32.xlu0 %v2638_v3, %s2597_s19  ;;  %1227 = vrot.lane.b32.xlu1 %v2634_v2, %s2597_s19 }
  0x31   : > { %570 = vrot.lane.b32.xlu0 %v151_v4, %s2593_s15  ;;  %1450 = vrot.lane.b32.xlu1 %v2632_v1, %s2598_s20 }
  0x35   : > { %1452 = vrot.lane.b32.xlu0 %v2638_v3, %s2598_s20  ;;  %1448 = vrot.lane.b32.xlu1 %v2634_v2, %s2598_s20 }
  0x39   : > { %791 = vrot.lane.b32.xlu0 %v151_v4, %s2595_s17  ;;  %1012 = vrot.lane.b32.xlu1 %v151_v4, %s2596_s18  ;;  %s2566_s17 = smul.u32 96, %s3059_s10 }
  0x3d   : > { %1673 = vrot.lane.b32.xlu1 %v2638_v3, %s2599_s21  ;;  %1671 = vrot.lane.b32.xlu0 %v2632_v1, %s2599_s21 }
  0x41   : > { %1233 = vrot.lane.b32.xlu1 %v151_v4, %s2597_s19  ;;  %1669 = vrot.lane.b32.xlu0 %v2634_v2, %s2599_s21 }
  0x45   : > { %1454 = vrot.lane.b32.xlu0 %v151_v4, %s2598_s20  ;;  %1892 = vrot.lane.b32.xlu1 %v2632_v1, %s2600_s22  ;;  %s3038_s20 = scalar_lea.vmem %s3057_s2, %s2566_s17 }
  0x49   : > { %1894 = vrot.lane.b32.xlu0 %v2638_v3, %s2600_s22  ;;  %1890 = vrot.lane.b32.xlu1 %v2634_v2, %s2600_s22 }
  0x4d   : > { %1675 = vrot.lane.b32.xlu0 %v151_v4, %s2599_s21  ;;  %1896 = vrot.lane.b32.xlu1 %v151_v4, %s2600_s22  ;;  %v2887_v4 = vld [vmem:[%s3056_s1 + $0xb0] sm:$0xff] }
  0x83   : > { %v567_v5 = vpop.permute.xlu0 %566  ;;  %v565_v6 = vpop.permute.xlu1 %564 }
  0x84   : > { %v2676_v11 = vsel %vm572_vm1, %v565_v6, %v567_v5  ;;  %v2901_v6 = vld [vmem:[%s3056_s1 + $0xb8] sm:$0xff] }
  0x87   : > { %v2662_v7 = vpop.permute.xlu0 %568  ;;  %v164_v8 = vpop.permute.xlu1 %163 }
  0x88   : > { %v2666_v9 = vsel %vm572_vm1, %v567_v5, %v2662_v7 }
  0x89   : > { %2247 = vmatprep.subr.msk.mxu0 %vm186_vm0, %v2666_v9 }
  0x8a   : > { %2248 = vmatpush1.msk.msra.mxu0 %vm186_vm0, %v2676_v11 }
  0x8b   : > { %v166_v12 = vpop.permute.xlu0 %165  ;;  %2249 = vmatmul.mubr.msk.f32.vlgmr.msra.gmra.mrb[0].mxu0 %vm173_vm2, %v2671_v10  ;;  %v162_v13 = vpop.permute.xlu1 %161 }
  0x8c   : > { %v171_v14 = vsel %vm169_vm3, %v164_v8, %v166_v12  ;;  %v170_v15 = vsel %vm169_vm3, %v162_v13, %v164_v8  ;;  %664 = vmatprep.mubr.f32.mxu0 %v2592_v0 }
  0x8d   : > { %2221 = vmatprep.subr.msk.mxu1 %vm186_vm0, %v171_v14 }
  0x8e   : > { %2222 = vmatpush1.msk.msra.mxu1 %vm186_vm0, %v170_v15  ;;  %v2304_v15 = vld [vmem:[%s3056_s1 + $0xc8] sm:$0xff] }
  0x8f   : > { %v788_v18 = vpop.permute.xlu0 %787  ;;  %2223 = vmatmul.mubr.msk.f32.vlgmr.msra.gmra.mrb[0].mxu1 %vm173_vm2, %v2217_v16  ;;  %2250 = vmatmul.mubr.msk.f32.gmra.mrb[2].mxu0 %vm173_vm2, %v2691_v17  ;;  %v2698_v19 = vpop.permute.xlu1 %789 }
  0x90   : > { %v795_v20 = vsel %vm793_vm4, %v788_v18, %v2698_v19  ;;  %263 = vmatprep.mubr.f32.mxu1 %v2592_v0  ;;  %670 = vmatprep.mubr.f32.mxu0 %v2592_v0 }
  0x91   : > { %2262 = vmatprep.subr.msk.mxu0 %vm186_vm0, %v795_v20  ;;  %v2318_v20 = vld [vmem:[%s3056_s1 + $0xe0] sm:$0xff] }
  0x93   : > { %v786_v23 = vpop.permute.xlu0 %785  ;;  %2224 = vmatmul.mubr.msk.f32.gmra.mrb[2].mxu1 %vm173_vm2, %v2218_v21  ;;  %2251 = vmatmul.mubr.msk.f32.gmra.mrb[4].mxu0 %vm173_vm2, %v2710_v22  ;;  %v168_v24 = vpop.permute.xlu1 %167 }
  0x94   : > { %v794_v25 = vsel %vm793_vm4, %v786_v23, %v788_v18  ;;  %v172_v26 = vsel %vm169_vm3, %v166_v12, %v168_v24  ;;  %269 = vmatprep.mubr.f32.mxu1 %v2592_v0  ;;  %879 = vmatprep.mubr.f32.mxu0 %v2592_v0  ;;  %v2306_v18 = vld [vmem:[%s3056_s1 + $0xd8] sm:$0xff]  ;;  %v2319_v23 = vld [vmem:[%s3056_s1 + $0xe8] sm:$0xff] }
  0x95   : > { %2396 = vmatprep.subr.msk.mxu1 %vm186_vm0, %v172_v26  ;;  %2263 = vmatpush1.msk.msra.mxu0 %vm186_vm0, %v794_v25 }
  0x96   : > { %2397 = vmatpush3.msk.msra.mxu1 %vm186_vm0, %v172_v26  ;;  %v2320_v26 = vld [vmem:[%s3056_s1 + $0xf0] sm:$0xff] }
  0x97   : > { %v1009_v29 = vpop.permute.xlu0 %1008  ;;  %2225 = vmatmul.mubr.msk.f32.gmra.mrb[4].mxu1 %vm173_vm2, %v2219_v27  ;;  %2264 = vmatmul.mubr.msk.f32.vlgmr.msra.gmra.mrb[0].mxu0 %vm173_vm2, %v2726_v28  ;;  %v2734_v30 = vpop.permute.xlu1 %1010 }
  0x98   : > { %v1016_v31 = vsel %vm1014_vm5, %v1009_v29, %v2734_v30  ;;  %275 = vmatprep.mubr.f32.mxu1 %v2592_v0  ;;  %885 = vmatprep.mubr.f32.mxu0 %v2592_v0 }
  0x99   : > { %2277 = vmatprep.subr.msk.mxu0 %vm186_vm0, %v1016_v31  ;;  %2232 = vmatprep.subr.msk.mxu1 %vm186_vm0, %v2632_v1  ;;  %v2334_v31 = vld [vmem:[%s3056_s1 + $0x108] sm:$0xff] }
  0x9b   : > { %v1007_v34 = vpop.permute.xlu0 %1006  ;;  %2226 = vmatmul.mubr.msk.f32.gmra.mrb[6].mxu1 %vm173_vm2, %v2220_v32  ;;  %2265 = vmatmul.mubr.msk.f32.gmra.mrb[2].mxu0 %vm173_vm2, %v2746_v33  ;;  %v1230_v37 = vpop.permute.xlu1 %1229 }
  0x9c   : > { %v1015_v35 = vsel %vm1014_vm5, %v1007_v34, %v1009_v29  ;;  %2398 = vmatprep.mubr.msk.f32.mxu1 %vm173_vm2, %v2217_v16  ;;  %891 = vmatprep.mubr.f32.mxu0 %v2592_v0 }
  0x9d   : > { %2278 = vmatpush1.msk.msra.mxu0 %vm186_vm0, %v1015_v35 }
  0x9f   : > { %v2763_v38 = vpop.permute.xlu0 %1231  ;;  %2399 = vmatmul.mubr.msk.f32.vlgmr.msra.gmra.mrb[8].mxu1 %vm173_vm2, %v2218_v21  ;;  %2266 = vmatmul.mubr.msk.f32.gmra.mrb[4].mxu0 %vm173_vm2, %v2760_v36  ;;  %v1228_v41 = vpop.permute.xlu1 %1227 }
  0xa0   : > { %v1237_v39 = vsel %vm1235_vm6, %v1230_v37, %v2763_v38  ;;  %2401 = vmatprep.mubr.msk.f32.mxu1 %vm173_vm2, %v2219_v27  ;;  %897 = vmatprep.mubr.f32.mxu0 %v2592_v0  ;;  %v1236_v45 = vsel %vm1235_vm6, %v1228_v41, %v1230_v37 }
  0xa1   : > { %2233 = vmatpush1.msk.msra.mxu1 %vm186_vm0, %v2634_v2  ;;  %2292 = vmatprep.subr.msk.mxu0 %vm186_vm0, %v1237_v39 }
  0xa2   : > { %2404 = vmatprep.subr.msk.mxu1 %vm186_vm0, %v2638_v3 }
  0xa3   : > { %v571_v42 = vpop.permute.xlu0 %570  ;;  %2402 = vmatmul.mubr.msk.f32.gmra.mrb[10].mxu1 %vm173_vm2, %v2220_v32  ;;  %2267 = vmatmul.mubr.msk.f32.gmra.mrb[6].mxu0 %vm173_vm2, %v2775_v40  ;;  %v1451_v48 = vpop.permute.xlu1 %1450  ;;  %v2335_v32 = vld [vmem:[%s3056_s1 + $0x110] sm:$0xff] }
  0xa4   : > { %449 = vmatprep.mubr.f32.mxu1 %v2592_v0  ;;  %1100 = vmatprep.mubr.f32.mxu0 %v2592_v0  ;;  %v575_v61 = vsel %vm572_vm1, %v2662_v7, %v571_v42 }
  0xa7   : > { %2234 = vmatmul.mubr.msk.f32.vlgmr.msra.gmra.mrb[0].mxu1 %vm173_vm2, %v147_v43  ;;  %2279 = vmatmul.mubr.msk.f32.vlgmr.msra.gmra.mrb[0].mxu0 %vm173_vm2, %v2793_v44  ;;  %v2810_v49 = vpop.permute.xlu0 %1452  ;;  %v1449_v53 = vpop.permute.xlu1 %1448 }
  0xa8   : > { %2405 = vmatpush3.msk.msra.mxu1 %vm186_vm0, %v2638_v3  ;;  %455 = vmatprep.mubr.f32.mxu1 %v2592_v0  ;;  %v1458_v50 = vsel %vm1456_vm7, %v1451_v48, %v2810_v49  ;;  %v1457_v60 = vsel %vm1456_vm7, %v1449_v53, %v1451_v48  ;;  %v2246_v3 = vld [vmem:[%s3056_s1 + $0x58] sm:$0xff] }
  0xa9   : > { %2468 = vmatprep.subr.msk.mxu1 %vm186_vm0, %v2666_v9  ;;  %1106 = vmatprep.mubr.f32.mxu0 %v2592_v0 }
  0xaa   : > { %2293 = vmatpush1.msk.msra.mxu0 %vm186_vm0, %v1236_v45 }
  0xab   : > { %2235 = vmatmul.mubr.msk.f32.gmra.mrb[2].mxu1 %vm173_vm2, %v148_v46  ;;  %2280 = vmatmul.mubr.msk.f32.gmra.mrb[2].mxu0 %vm173_vm2, %v2808_v47  ;;  %v792_v56 = vpop.permute.xlu0 %791  ;;  %v1013_v58 = vpop.permute.xlu1 %1012 }
  0xac   : > { %461 = vmatprep.mubr.f32.mxu1 %v2592_v0  ;;  %1112 = vmatprep.mubr.f32.mxu0 %v2592_v0  ;;  %v796_v5 = vsel %vm793_vm4, %v2698_v19, %v792_v56  ;;  %v1017_v9 = vsel %vm1014_vm5, %v2734_v30, %v1013_v58  ;;  %v2333_v30 = vld [vmem:[%s3056_s1 + $0x100] sm:$0xff] }
  0xad   : > { %2307 = vmatprep.subr.msk.mxu0 %vm186_vm0, %v1458_v50 }
  0xaf   : > { %2236 = vmatmul.mubr.msk.f32.gmra.mrb[4].mxu1 %vm173_vm2, %v149_v51  ;;  %2281 = vmatmul.mubr.msk.f32.gmra.mrb[4].mxu0 %vm173_vm2, %v2829_v52  ;;  %v1672_v59 = vpop.permute.xlu0 %1671  ;;  %v2869_v63 = vpop.permute.xlu1 %1673 }
  0xb0   : > { %467 = vmatprep.mubr.f32.mxu1 %v2592_v0  ;;  %1118 = vmatprep.mubr.f32.mxu0 %v2592_v0  ;;  %v1679_v1 = vsel %vm1677_vm8, %v1672_v59, %v2869_v63 }
  0xb3   : > { %2237 = vmatmul.mubr.msk.f32.gmra.mrb[6].mxu1 %vm173_vm2, %v150_v54  ;;  %2282 = vmatmul.mubr.msk.f32.gmra.mrb[6].mxu0 %vm173_vm2, %v2843_v55  ;;  %v1670_v2 = vpop.permute.xlu0 %1669  ;;  %v1234_v7 = vpop.permute.xlu1 %1233 }
  0xb4   : > { %2406 = vmatprep.mubr.msk.f32.mxu1 %vm173_vm2, %v147_v43  ;;  %1321 = vmatprep.mubr.f32.mxu0 %v2592_v0  ;;  %v1238_v16 = vsel %vm1235_vm6, %v2763_v38, %v1234_v7 }
  0xb7   : > { %2407 = vmatmul.mubr.msk.f32.vlgmr.msra.gmra.mrb[8].mxu1 %vm173_vm2, %v148_v46  ;;  %2294 = vmatmul.mubr.msk.f32.vlgmr.msra.gmra.mrb[0].mxu0 %vm173_vm2, %v2853_v57  ;;  %v1455_v8 = vpop.permute.xlu0 %1454  ;;  %v1893_v13 = vpop.permute.xlu1 %1892 }
  0xb8   : > { %2469 = vmatpush1.msk.msra.mxu1 %vm186_vm0, %v2676_v11  ;;  %2409 = vmatprep.mubr.msk.f32.mxu1 %vm173_vm2, %v149_v51  ;;  %v1678_v11 = vsel %vm1677_vm8, %v1670_v2, %v1672_v59  ;;  %v1459_v19 = vsel %vm1456_vm7, %v2810_v49, %v1455_v8 }
  0xb9   : > { %2412 = vmatprep.subr.msk.mxu1 %vm186_vm0, %v575_v61  ;;  %1327 = vmatprep.mubr.f32.mxu0 %v2592_v0 }
  0xba   : > { %2308 = vmatpush1.msk.msra.mxu0 %vm186_vm0, %v1457_v60 }
  0xbb   : > { %2410 = vmatmul.mubr.msk.f32.gmra.mrb[10].mxu1 %vm173_vm2, %v150_v54  ;;  %2295 = vmatmul.mubr.msk.f32.gmra.mrb[2].mxu0 %vm173_vm2, %v2867_v62  ;;  %v1895_v12 = vpop.permute.xlu0 %1894  ;;  %v1891_v21 = vpop.permute.xlu1 %1890 }
  0xbc   : > { %676 = vmatprep.mubr.f32.mxu1 %v2592_v0  ;;  %1333 = vmatprep.mubr.f32.mxu0 %v2592_v0  ;;  %v1900_v14 = vsel %vm1898_vm9, %v1893_v13, %v1895_v12 }
  0xbd   : > { %2322 = vmatprep.subr.msk.mxu0 %vm186_vm0, %v1679_v1 }
  0xbf   : > { %2252 = vmatmul.mubr.msk.f32.vlgmr.msra.gmra.mrb[6].mxu1 %vm173_vm2, %v2246_v3  ;;  %2296 = vmatmul.mubr.msk.f32.gmra.mrb[4].mxu0 %vm173_vm2, %v2887_v4  ;;  %v1676_v24 = vpop.permute.xlu0 %1675  ;;  %v1897_v27 = vpop.permute.xlu1 %1896 }
  0xc0   : > { %2413 = vmatpush3.msk.msra.mxu1 %vm186_vm0, %v575_v61  ;;  %2414 = vmatprep.mubr.msk.f32.mxu1 %vm173_vm2, %v2671_v10  ;;  %v2303_v10 = vld [vmem:[%s3056_s1 + $0xc0] sm:$0xff]  ;;  %v1680_v25 = vsel %vm1677_vm8, %v2869_v63, %v1676_v24  ;;  %v1901_v29 = vsel %vm1898_vm9, %v1895_v12, %v1897_v27 }
  0xc1   : > { %2420 = vmatprep.subr.msk.mxu1 %vm186_vm0, %v796_v5  ;;  %1339 = vmatprep.mubr.f32.mxu0 %v2592_v0 }
  0xc3   : > { %2415 = vmatmul.mubr.msk.f32.vlgmr.msra.gmra.mrb[8].mxu1 %vm173_vm2, %v2691_v17  ;;  %2297 = vmatmul.mubr.msk.f32.gmra.mrb[6].mxu0 %vm173_vm2, %v2901_v6  ;;  %v2305_v17 = vld [vmem:[%s3056_s1 + $0xd0] sm:$0xff] }
  0xc4   : > { %2421 = vmatpush3.msk.msra.mxu1 %vm186_vm0, %v796_v5  ;;  %2417 = vmatprep.mubr.msk.f32.mxu1 %vm173_vm2, %v2710_v22  ;;  %v1899_v22 = vsel %vm1898_vm9, %v1891_v21, %v1893_v13 }
  0xc5   : > { %2428 = vmatprep.subr.msk.mxu1 %vm186_vm0, %v1017_v9  ;;  %1542 = vmatprep.mubr.f32.mxu0 %v2592_v0 }
  0xc7   : > { %2418 = vmatmul.mubr.msk.f32.gmra.mrb[10].mxu1 %vm173_vm2, %v2246_v3  ;;  %2309 = vmatmul.mubr.msk.f32.vlgmr.msra.gmra.mrb[0].mxu0 %vm173_vm2, %v2303_v10 }
  0xc8   : > { %2422 = vmatprep.mubr.msk.f32.mxu1 %vm173_vm2, %v2726_v28  ;;  %1548 = vmatprep.mubr.f32.mxu0 %v2592_v0  ;;  %v2321_v28 = vld [vmem:[%s3056_s1 + $0xf8] sm:$0xff] }
  0xc9   : > { %2323 = vmatpush1.msk.msra.mxu0 %vm186_vm0, %v1678_v11 }
  0xca   : > { %2337 = vmatprep.subr.msk.mxu0 %vm186_vm0, %v1900_v14 }
  0xcb   : > { %2423 = vmatmul.mubr.msk.f32.vlgmr.msra.gmra.mrb[8].mxu1 %vm173_vm2, %v2746_v33  ;;  %2310 = vmatmul.mubr.msk.f32.gmra.mrb[2].mxu0 %vm173_vm2, %v2304_v15  ;;  %v2336_v33 = vld [vmem:[%s3056_s1 + $0x118] sm:$0xff] }
  0xcc   : > { %2429 = vmatpush3.msk.msra.mxu1 %vm186_vm0, %v1017_v9  ;;  %2425 = vmatprep.mubr.msk.f32.mxu1 %vm173_vm2, %v2760_v36 }
  0xcd   : > { %2436 = vmatprep.subr.msk.mxu1 %vm186_vm0, %v1238_v16  ;;  %1554 = vmatprep.mubr.f32.mxu0 %v2592_v0 }
  0xcf   : > { %2426 = vmatmul.mubr.msk.f32.gmra.mrb[10].mxu1 %vm173_vm2, %v2775_v40  ;;  %2311 = vmatmul.mubr.msk.f32.gmra.mrb[4].mxu0 %vm173_vm2, %v2305_v17 }
  0xd0   : > { %2430 = vmatprep.mubr.msk.f32.mxu1 %vm173_vm2, %v2793_v44  ;;  %1560 = vmatprep.mubr.f32.mxu0 %v2592_v0 }
  0xd3   : > { %2431 = vmatmul.mubr.msk.f32.vlgmr.msra.gmra.mrb[8].mxu1 %vm173_vm2, %v2808_v47  ;;  %2312 = vmatmul.mubr.msk.f32.gmra.mrb[6].mxu0 %vm173_vm2, %v2306_v18 }
  0xd4   : > { %2437 = vmatpush3.msk.msra.mxu1 %vm186_vm0, %v1238_v16  ;;  %2433 = vmatprep.mubr.msk.f32.mxu1 %vm173_vm2, %v2829_v52 }
  0xd5   : > { %2444 = vmatprep.subr.msk.mxu1 %vm186_vm0, %v1459_v19  ;;  %1763 = vmatprep.mubr.f32.mxu0 %v2592_v0 }
  0xd7   : > { %2434 = vmatmul.mubr.msk.f32.gmra.mrb[10].mxu1 %vm173_vm2, %v2843_v55  ;;  %2324 = vmatmul.mubr.msk.f32.vlgmr.msra.gmra.mrb[0].mxu0 %vm173_vm2, %v2318_v20 }
  0xd8   : > { %2438 = vmatprep.mubr.msk.f32.mxu1 %vm173_vm2, %v2853_v57  ;;  %1769 = vmatprep.mubr.f32.mxu0 %v2592_v0 }
  0xd9   : > { %2338 = vmatpush1.msk.msra.mxu0 %vm186_vm0, %v1899_v22 }
  0xdb   : > { %2439 = vmatmul.mubr.msk.f32.vlgmr.msra.gmra.mrb[8].mxu1 %vm173_vm2, %v2867_v62  ;;  %2325 = vmatmul.mubr.msk.f32.gmra.mrb[2].mxu0 %vm173_vm2, %v2319_v23 }
  0xdc   : > { %2445 = vmatpush3.msk.msra.mxu1 %vm186_vm0, %v1459_v19  ;;  %2441 = vmatprep.mubr.msk.f32.mxu1 %vm173_vm2, %v2887_v4 }
  0xdd   : > { %2452 = vmatprep.subr.msk.mxu1 %vm186_vm0, %v1680_v25  ;;  %1775 = vmatprep.mubr.f32.mxu0 %v2592_v0 }
  0xdf   : > { %2442 = vmatmul.mubr.msk.f32.gmra.mrb[10].mxu1 %vm173_vm2, %v2901_v6  ;;  %2326 = vmatmul.mubr.msk.f32.gmra.mrb[4].mxu0 %vm173_vm2, %v2320_v26 }
  0xe0   : > { %2446 = vmatprep.mubr.msk.f32.mxu1 %vm173_vm2, %v2303_v10  ;;  %1781 = vmatprep.mubr.f32.mxu0 %v2592_v0 }
  0xe3   : > { %2447 = vmatmul.mubr.msk.f32.vlgmr.msra.gmra.mrb[8].mxu1 %vm173_vm2, %v2304_v15  ;;  %2327 = vmatmul.mubr.msk.f32.gmra.mrb[6].mxu0 %vm173_vm2, %v2321_v28 }
  0xe4   : > { %2453 = vmatpush3.msk.msra.mxu1 %vm186_vm0, %v1680_v25  ;;  %2449 = vmatprep.mubr.msk.f32.mxu1 %vm173_vm2, %v2305_v17 }
  0xe5   : > { %2460 = vmatprep.subr.msk.mxu1 %vm186_vm0, %v1901_v29  ;;  %1984 = vmatprep.mubr.f32.mxu0 %v2592_v0 }
  0xe7   : > { %2450 = vmatmul.mubr.msk.f32.gmra.mrb[10].mxu1 %vm173_vm2, %v2306_v18  ;;  %2339 = vmatmul.mubr.msk.f32.vlgmr.msra.gmra.mrb[0].mxu0 %vm173_vm2, %v2333_v30 }
  0xe8   : > { %2454 = vmatprep.mubr.msk.f32.mxu1 %vm173_vm2, %v2318_v20  ;;  %1990 = vmatprep.mubr.f32.mxu0 %v2592_v0 }
  0xeb   : > { %2455 = vmatmul.mubr.msk.f32.vlgmr.msra.gmra.mrb[8].mxu1 %vm173_vm2, %v2319_v23  ;;  %2340 = vmatmul.mubr.msk.f32.gmra.mrb[2].mxu0 %vm173_vm2, %v2334_v31 }
  0xec   : > { %2461 = vmatpush3.msk.msra.mxu1 %vm186_vm0, %v1901_v29  ;;  %2457 = vmatprep.mubr.msk.f32.mxu1 %vm173_vm2, %v2320_v26 }
  0xed   : > { %1996 = vmatprep.mubr.f32.mxu0 %v2592_v0 }
  0xef   : > { %2458 = vmatmul.mubr.msk.f32.gmra.mrb[10].mxu1 %vm173_vm2, %v2321_v28  ;;  %2341 = vmatmul.mubr.msk.f32.gmra.mrb[4].mxu0 %vm173_vm2, %v2335_v32 }
  0xf0   : > { %2002 = vmatprep.mubr.f32.mxu0 %v2592_v0  ;;  %2462 = vmatprep.mubr.msk.f32.mxu1 %vm173_vm2, %v2333_v30 }
  0xf3   : > { %2342 = vmatmul.mubr.msk.f32.gmra.mrb[6].mxu0 %vm173_vm2, %v2336_v33  ;;  %2463 = vmatmul.mubr.msk.f32.vlgmr.msra.gmra.mrb[8].mxu1 %vm173_vm2, %v2334_v31 }
  0xf4   : > { %2465 = vmatprep.mubr.msk.f32.mxu1 %vm173_vm2, %v2335_v32 }
  0xf7   : > { %2466 = vmatmul.mubr.msk.f32.gmra.mrb[10].mxu1 %vm173_vm2, %v2336_v33 }
 0x17a   : > { %v451_v34 = vpop.f32.mrb[0].mxu1 }
 0x17b   : > { %v453_v35 = vpop.f32.mrb[1].mxu1 }
 0x17e   : > { %v457_v36 = vpop.f32.mrb[2].mxu1 }
 0x17f   : > { %v459_v37 = vpop.f32.mrb[3].mxu1 }
 0x182   : > { %v463_v38 = vpop.f32.mrb[4].mxu1 }
 0x183   : > { %v465_v0 = vpop.f32.mrb[5].mxu1 }
 0x192   : > { %v678_v39 = vpop.f32.mrb[6].mxu1 }
 0x193   : > { %v680_v40 = vpop.f32.mrb[7].mxu1 }
 0x1ba   : > { %v1986_v41 = vpop.f32.mrb[0].mxu0 }
 0x1bb   : > { %v2470_v42 = vadd.f32 %v1986_v41, %v451_v34  ;;  %v1988_v43 = vpop.f32.mrb[1].mxu0 }
 0x1bc   : > { %v2471_v44 = vadd.f32 %v1988_v43, %v453_v35 }
 0x1bd   : > { %vm2106_vm10 = vcmp.ge.f32.partialorder %v2470_v42, 0.0  ;;  %v2118_v45 = vmul.f32 0.1, %v2470_v42 }
 0x1be   : > { %vm2107_vm11 = vcmp.ge.f32.partialorder %v2471_v44, 0.0  ;;  %v2119_v46 = vmul.f32 0.1, %v2471_v44  ;;  %v1992_v47 = vpop.f32.mrb[2].mxu0 }
 0x1bf   : > { %v2130_v48 = vsel %vm2106_vm10, %v2470_v42, %v2118_v45  ;;  %v2472_v49 = vadd.f32 %v1992_v47, %v457_v36  ;;  %v1994_v50 = vpop.f32.mrb[3].mxu0 }
 0x1c0   : > { %2142 = vst [vmem:[%s3038_s20] sm:$0xff] %v2130_v48  ;;  %v2131_v51 = vsel %vm2107_vm11, %v2471_v44, %v2119_v46  ;;  %v2473_v52 = vadd.f32 %v1994_v50, %v459_v37 }
 0x1c1   : > { %2143 = vst [vmem:[%s3038_s20 + $0x8] sm:$0xff] %v2131_v51  ;;  %vm2109_vm12 = vcmp.ge.f32.partialorder %v2472_v49, 0.0  ;;  %v2121_v53 = vmul.f32 0.1, %v2472_v49 }
 0x1c2   : > { %vm2110_vm13 = vcmp.ge.f32.partialorder %v2473_v52, 0.0  ;;  %v2122_v54 = vmul.f32 0.1, %v2473_v52  ;;  %v1998_v55 = vpop.f32.mrb[4].mxu0 }
 0x1c3   : > { %v2133_v56 = vsel %vm2109_vm12, %v2472_v49, %v2121_v53  ;;  %v2474_v57 = vadd.f32 %v1998_v55, %v463_v38  ;;  %v2000_v58 = vpop.f32.mrb[5].mxu0 }
 0x1c4   : > { %2145 = vst [vmem:[%s3038_s20 + $0x18] sm:$0xff] %v2133_v56  ;;  %v2134_v59 = vsel %vm2110_vm13, %v2473_v52, %v2122_v54  ;;  %v2475_v60 = vadd.f32 %v2000_v58, %v465_v0 }
 0x1c5   : > { %2146 = vst [vmem:[%s3038_s20 + $0x20] sm:$0xff] %v2134_v59  ;;  %vm2112_vm14 = vcmp.ge.f32.partialorder %v2474_v57, 0.0  ;;  %v2124_v61 = vmul.f32 0.1, %v2474_v57 }
 0x1c6   : > { %vm2113_vm15 = vcmp.ge.f32.partialorder %v2475_v60, 0.0  ;;  %v2125_v62 = vmul.f32 0.1, %v2475_v60  ;;  %v2004_v63 = vpop.f32.mrb[6].mxu0  ;;  %v2464_v1 = vpop.f32.mrb[8].mxu1 }
 0x1c7   : > { %v2136_v2 = vsel %vm2112_vm14, %v2474_v57, %v2124_v61  ;;  %v2476_v3 = vadd.f32 %v2004_v63, %v678_v39  ;;  %vm2111_vm0 = vcmp.ge.f32.partialorder %v2464_v1, 0.0  ;;  %v2123_v4 = vmul.f32 0.1, %v2464_v1  ;;  %v2006_v5 = vpop.f32.mrb[7].mxu0  ;;  %v2075_v6 = vpop.f32.mrb[9].mxu1 }
 0x1c8   : > { %2148 = vst [vmem:[%s3038_s20 + $0x30] sm:$0xff] %v2136_v2  ;;  %v2137_v7 = vsel %vm2113_vm15, %v2475_v60, %v2125_v62  ;;  %v2477_v8 = vadd.f32 %v2006_v5, %v680_v40  ;;  %vm2108_vm1 = vcmp.ge.f32.partialorder %v2075_v6, 0.0  ;;  %v2120_v9 = vmul.f32 0.1, %v2075_v6 }
 0x1c9   : > { %2149 = vst [vmem:[%s3038_s20 + $0x38] sm:$0xff] %v2137_v7  ;;  %vm2115_vm2 = vcmp.ge.f32.partialorder %v2476_v3, 0.0  ;;  %v2127_v10 = vmul.f32 0.1, %v2476_v3  ;;  %v2135_v11 = vsel %vm2111_vm0, %v2464_v1, %v2123_v4 }
 0x1ca   : > { %2147 = vst [vmem:[%s3038_s20 + $0x28] sm:$0xff] %v2135_v11  ;;  %vm2116_vm3 = vcmp.ge.f32.partialorder %v2477_v8, 0.0  ;;  %v2128_v12 = vmul.f32 0.1, %v2477_v8  ;;  %v2132_v13 = vsel %vm2108_vm1, %v2075_v6, %v2120_v9  ;;  %v2467_v14 = vpop.f32.mrb[10].mxu1 }
 0x1cb   : > { %v2139_v15 = vsel %vm2115_vm2, %v2476_v3, %v2127_v10  ;;  %2144 = vst [vmem:[%s3038_s20 + $0x10] sm:$0xff] %v2132_v13  ;;  %vm2117_vm4 = vcmp.ge.f32.partialorder %v2467_v14, 0.0  ;;  %v2129_v16 = vmul.f32 0.1, %v2467_v14  ;;  %v2085_v17 = vpop.f32.mrb[11].mxu1 }
 0x1cc   : > { %2151 = vst [vmem:[%s3038_s20 + $0x48] sm:$0xff] %v2139_v15  ;;  %v2140_v18 = vsel %vm2116_vm3, %v2477_v8, %v2128_v12  ;;  %vm2114_vm5 = vcmp.ge.f32.partialorder %v2085_v17, 0.0  ;;  %v2126_v19 = vmul.f32 0.1, %v2085_v17 }
 0x1cd   : > { %2152 = vst [vmem:[%s3038_s20 + $0x50] sm:$0xff] %v2140_v18  ;;  %v2141_v20 = vsel %vm2117_vm4, %v2467_v14, %v2129_v16 }
 0x1ce   : > { %2153 = vst [vmem:[%s3038_s20 + $0x58] sm:$0xff] %v2141_v20  ;;  %v2138_v21 = vsel %vm2114_vm5, %v2085_v17, %v2126_v19 }
 0x1cf   : > { %2150 = vst [vmem:[%s3038_s20 + $0x40] sm:$0xff] %v2138_v21 }
 0x1d0 PF: > { %s12_s9 = sadd.s32 1, %s2590_s9  }
 0x1d1   : > { %p9_p4 = scmp.ge.s32.totalorder %s12_s9, 4  }
 0x1d3   :  { %11 = sbr.rel (!%p9_p4) target bundleno = 1 (0x1), region = 66 }

</bundles_post_ra>
